<compile_context>
chip_gen: v6e
topology: v6e:2x2x1
jax: 0.10.0
libtpu: 0.0.40
codegen_flags: <defaults>
</compile_context>

<pallas_src>
import functools

import jax
import jax.numpy as jnp
import numpy as np
from jax.experimental import pallas as pl
from jax.experimental.pallas import tpu as pltpu

# ----------------------------- small config ---------------------------------
B = 4          # batch
N_MELS = 32    # mel bins  (sublane axis, multiple of 8)
T = 128        # time frames (lane axis, multiple of 128 -> lane-dense stores)
BLOCK_B = 2    # batch elements per grid step (amortizes grid overhead)
EPS = 1e-6


def _reduce(x, op):
    """Reduce a (BB, F, T) tile over (F, T) -> (BB, 1, 1), chained per axis."""
    y = op(x, axis=2, keepdims=True)
    return op(y, axis=1, keepdims=True)


# ------------------------------ Pallas kernel -------------------------------
def normalize_melspec_kernel(x_ref, o_ref, *, eps, n_elems):
    x = x_ref[...]                                        # (BB, F, T) float32

    # per-sample mean / unbiased std over (mel, time)
    mean = _reduce(x, jnp.sum) * (1.0 / n_elems)          # (BB, 1, 1)
    diff = x - mean
    var = _reduce(diff * diff, jnp.sum) * (1.0 / (n_elems - 1))
    std = jnp.sqrt(var)

    inv_denom = 1.0 / (std + eps)                         # per-sample scalar divide
    xstd = diff * inv_denom                               # (BB, F, T)

    # per-sample min / max of the standardized spectrogram
    mn = _reduce(xstd, jnp.min)                           # (BB, 1, 1)
    mx = _reduce(xstd, jnp.max)
    rng = mx - mn
    ok = rng > eps                                        # (BB, 1, 1) bool

    # guarded per-sample reciprocal of the range (0 where the sample is ~constant)
    inv_rng = jnp.where(ok, 1.0 / jnp.where(ok, rng, 1.0), 0.0)

    # clamp (no-op mathematically, kept for exact parity with the reference) + rescale
    v = (jnp.minimum(jnp.maximum(xstd, mn), mx) - mn) * inv_rng
    o_ref[...] = jnp.where(ok, v, 0.0)


# ------------------------------ wrapper (glue) -------------------------------
def normalize_melspec_pallas(x, *, eps=EPS, block_b=BLOCK_B):
    Bv, F, Tt = x.shape
    assert Bv % block_b == 0, "pick block_b dividing the batch"
    x = x.astype(jnp.float32)

    kern = functools.partial(normalize_melspec_kernel, eps=eps, n_elems=F * Tt)

    return pl.pallas_call(
        kern,
        out_shape=jax.ShapeDtypeStruct((Bv, F, Tt), jnp.float32),
        grid=(Bv // block_b,),
        in_specs=[pl.BlockSpec((block_b, F, Tt), lambda b: (b, 0, 0))],
        out_specs=pl.BlockSpec((block_b, F, Tt), lambda b: (b, 0, 0)),
        compiler_params=pltpu.CompilerParams(
            dimension_semantics=("parallel",),   # independent per-sample -> megacore
        ),
    )(x)


# ---------------------------- pure-JAX reference ------------------------------
def normalize_melspec_ref(X, eps=EPS):
    X = X.astype(jnp.float32)
    mean = X.mean(axis=(1, 2), keepdims=True)
    std = jnp.std(X, axis=(1, 2), keepdims=True, ddof=1)        # torch.std unbiased
    Xstd = (X - mean) / (std + eps)
    norm_min = Xstd.min(axis=(1, 2), keepdims=True)
    norm_max = Xstd.max(axis=(1, 2), keepdims=True)
    fix = (norm_max - norm_min) > eps
    rng = jnp.where(fix, norm_max - norm_min, 1.0)
    Vfix = (jnp.clip(Xstd, norm_min, norm_max) - norm_min) / rng
    return jnp.where(fix, Vfix, 0.0)


# ----------------------------------- main -------------------------------------
if __name__ == "__main__":
    key = jax.random.PRNGKey(0)
    x = 4.0 * jax.random.normal(key, (B, N_MELS, T), jnp.float32) - 1.5
    # make one sample constant to exercise the "fix_ind == False" (all-zeros) branch
    x = x.at[1].set(3.0)

    out = normalize_melspec_pallas(x)
    out = jax.block_until_ready(out)

    ref = normalize_melspec_ref(x)
    np.testing.assert_allclose(np.asarray(out), np.asarray(ref), rtol=1e-4, atol=1e-5)

    # sanity: normalized samples live in [0, 1]; constant sample is all zeros
    assert float(jnp.max(out)) <= 1.0 + 1e-5 and float(jnp.min(out)) >= -1e-5
    assert float(jnp.max(jnp.abs(out[1]))) == 0.0

    print("KERNEL_OK")
</pallas_src>

<mosaic_0001>
module attributes {stable_mosaic.version = 11 : i64} {
  func.func @normalize_melspec_kernel(%arg0: i32, %arg1: memref<2x32x128xf32, #tpu.memory_space<vmem>>, %arg2: memref<2x32x128xf32, #tpu.memory_space<vmem>>) attributes {dimension_semantics = [#tpu.dimension_semantics<parallel>], iteration_bounds = array<i64: 2>, scalar_prefetch = 0 : i64, scratch_operands = 0 : i64, tpu.core_type = #tpu.core_type<tc>, window_params = [{transform_indices = @transform_0, window_bounds = array<i64: 2, 32, 128>}, {transform_indices = @transform_1, window_bounds = array<i64: 2, 32, 128>}]} {
    %c0 = arith.constant 0 : index
    %c0_0 = arith.constant 0 : index
    %c0_1 = arith.constant 0 : index
    %0 = vector.load %arg1[%c0, %c0_0, %c0_1] : memref<2x32x128xf32, #tpu.memory_space<vmem>>, vector<2x32x128xf32>
    %cst = arith.constant dense<0.000000e+00> : vector<2x32xf32>
    %1 = vector.multi_reduction <add>, %0, %cst [2] : vector<2x32x128xf32> to vector<2x32xf32>
    %2 = vector.shape_cast %1 : vector<2x32xf32> to vector<2x32x1xf32>
    %cst_2 = arith.constant dense<0.000000e+00> : vector<2x1xf32>
    %3 = vector.multi_reduction <add>, %2, %cst_2 [1] : vector<2x32x1xf32> to vector<2x1xf32>
    %4 = vector.shape_cast %3 : vector<2x1xf32> to vector<2x1x1xf32>
    %cst_3 = arith.constant 2.44140625E-4 : f32
    %5 = vector.broadcast %cst_3 : f32 to vector<2x1x1xf32>
    %6 = arith.mulf %4, %5 : vector<2x1x1xf32>
    %7 = vector.broadcast %6 : vector<2x1x1xf32> to vector<2x32x128xf32>
    %8 = arith.subf %0, %7 : vector<2x32x128xf32>
    %9 = arith.mulf %8, %8 : vector<2x32x128xf32>
    %cst_4 = arith.constant dense<0.000000e+00> : vector<2x32xf32>
    %10 = vector.multi_reduction <add>, %9, %cst_4 [2] : vector<2x32x128xf32> to vector<2x32xf32>
    %11 = vector.shape_cast %10 : vector<2x32xf32> to vector<2x32x1xf32>
    %cst_5 = arith.constant dense<0.000000e+00> : vector<2x1xf32>
    %12 = vector.multi_reduction <add>, %11, %cst_5 [1] : vector<2x32x1xf32> to vector<2x1xf32>
    %13 = vector.shape_cast %12 : vector<2x1xf32> to vector<2x1x1xf32>
    %cst_6 = arith.constant 2.44200259E-4 : f32
    %14 = vector.broadcast %cst_6 : f32 to vector<2x1x1xf32>
    %15 = arith.mulf %13, %14 : vector<2x1x1xf32>
    %16 = math.sqrt %15 : vector<2x1x1xf32>
    %cst_7 = arith.constant 9.99999997E-7 : f32
    %17 = vector.broadcast %cst_7 : f32 to vector<2x1x1xf32>
    %18 = arith.addf %16, %17 : vector<2x1x1xf32>
    %cst_8 = arith.constant 1.000000e+00 : f32
    %19 = vector.broadcast %cst_8 : f32 to vector<2x1x1xf32>
    %20 = arith.divf %19, %18 : vector<2x1x1xf32>
    %21 = vector.broadcast %20 : vector<2x1x1xf32> to vector<2x32x128xf32>
    %22 = arith.mulf %8, %21 : vector<2x32x128xf32>
    %cst_9 = arith.constant dense<0x7F800000> : vector<2x32xf32>
    %23 = vector.multi_reduction <minimumf>, %22, %cst_9 [2] : vector<2x32x128xf32> to vector<2x32xf32>
    %24 = vector.shape_cast %23 : vector<2x32xf32> to vector<2x32x1xf32>
    %cst_10 = arith.constant dense<0x7F800000> : vector<2x1xf32>
    %25 = vector.multi_reduction <minimumf>, %24, %cst_10 [1] : vector<2x32x1xf32> to vector<2x1xf32>
    %26 = vector.shape_cast %25 : vector<2x1xf32> to vector<2x1x1xf32>
    %cst_11 = arith.constant dense<0xFF800000> : vector<2x32xf32>
    %27 = vector.multi_reduction <maximumf>, %22, %cst_11 [2] : vector<2x32x128xf32> to vector<2x32xf32>
    %28 = vector.shape_cast %27 : vector<2x32xf32> to vector<2x32x1xf32>
    %cst_12 = arith.constant dense<0xFF800000> : vector<2x1xf32>
    %29 = vector.multi_reduction <maximumf>, %28, %cst_12 [1] : vector<2x32x1xf32> to vector<2x1xf32>
    %30 = vector.shape_cast %29 : vector<2x1xf32> to vector<2x1x1xf32>
    %31 = arith.subf %30, %26 : vector<2x1x1xf32>
    %cst_13 = arith.constant 9.99999997E-7 : f32
    %32 = vector.broadcast %cst_13 : f32 to vector<2x1x1xf32>
    %33 = arith.cmpf ogt, %31, %32 : vector<2x1x1xf32>
    %cst_14 = arith.constant 1.000000e+00 : f32
    %34 = vector.broadcast %cst_14 : f32 to vector<2x1x1xf32>
    %35 = arith.select %33, %31, %34 : vector<2x1x1xi1>, vector<2x1x1xf32>
    %cst_15 = arith.constant 1.000000e+00 : f32
    %36 = vector.broadcast %cst_15 : f32 to vector<2x1x1xf32>
    %37 = arith.divf %36, %35 : vector<2x1x1xf32>
    %cst_16 = arith.constant 0.000000e+00 : f32
    %38 = vector.broadcast %cst_16 : f32 to vector<2x1x1xf32>
    %39 = arith.select %33, %37, %38 : vector<2x1x1xi1>, vector<2x1x1xf32>
    %40 = vector.broadcast %26 : vector<2x1x1xf32> to vector<2x32x128xf32>
    %41 = arith.maximumf %22, %40 : vector<2x32x128xf32>
    %42 = vector.broadcast %30 : vector<2x1x1xf32> to vector<2x32x128xf32>
    %43 = arith.minimumf %41, %42 : vector<2x32x128xf32>
    %44 = vector.broadcast %26 : vector<2x1x1xf32> to vector<2x32x128xf32>
    %45 = arith.subf %43, %44 : vector<2x32x128xf32>
    %46 = vector.broadcast %39 : vector<2x1x1xf32> to vector<2x32x128xf32>
    %47 = arith.mulf %45, %46 : vector<2x32x128xf32>
    %cst_17 = arith.constant 0.000000e+00 : f32
    %48 = vector.shape_cast %33 : vector<2x1x1xi1> to vector<2x1x1xi1>
    %49 = vector.broadcast %48 : vector<2x1x1xi1> to vector<2x32x128xi1>
    %50 = vector.broadcast %cst_17 : f32 to vector<2x32x128xf32>
    %51 = arith.select %49, %47, %50 : vector<2x32x128xi1>, vector<2x32x128xf32>
    %c0_18 = arith.constant 0 : index
    %c0_19 = arith.constant 0 : index
    %c0_20 = arith.constant 0 : index
    %52 = vector.load %arg2[%c0_18, %c0_19, %c0_20] : memref<2x32x128xf32, #tpu.memory_space<vmem>>, vector<2x32x128xf32>
    tpu.vector_store %arg2[%c0_18, %c0_19, %c0_20], %51 {strides = array<i32>} : memref<2x32x128xf32, #tpu.memory_space<vmem>>, vector<2x32x128xf32>,
    return
  }
  func.func @transform_0(%arg0: i32) -> (i32, i32, i32) {
    %c0_i32 = arith.constant 0 : i32
    %c0_i32_0 = arith.constant 0 : i32
    %c0_i32_1 = arith.constant 0 : i32
    return %arg0, %c0_i32, %c0_i32_0 : i32, i32, i32
  }
  func.func @transform_1(%arg0: i32) -> (i32, i32, i32) {
    %c0_i32 = arith.constant 0 : i32
    %c0_i32_0 = arith.constant 0 : i32
    %c0_i32_1 = arith.constant 0 : i32
    return %arg0, %c0_i32, %c0_i32_0 : i32, i32, i32
  }
}

</mosaic_0001>

<bundles_post_ra>
// kernel: tpu_custom_call.1
= control target key start
LH: loop header
LB: loop body
LE: loop exit
PB: predicated region body
PF: predicated region fallthrough
CT: control target
= control target key end

     0   :  { %6 = vsyncpa [#allocation3], 0  ;;  %s919_s0 = inlined_call_operand.hbm [shape: f32[4,32,128], index: 0, kind: input, shape index: {}]   ;;  %s920_s1 = inlined_call_operand.hbm [shape: f32[4,32,128], index: 1, kind: output, shape index: {}]  }
   0x1   :  { %8 = vsyncpa [#allocation3 + $0x1], 0 }
   0x2   :  { %9 = vsyncpa [#allocation4], 0 }
   0x3   :  { %11 = vsyncpa [#allocation4 + $0x1], 0  ;;  %s674_s6 = smov 0   ;;  %s676_s7 = smov 0  }
   0x4   :  { %s678_s8 = smov 0   ;;  %s680_s9 = smov 0  }
   0x5 LB: > { %s695_s10 = sadd.s32 4294967295, %s656_s9   ;;  %s482_s11 = sadd.s32 4294967294, %s656_s9   ;;  %s656_s9 = sphi %s680_s9, %s935_s9   ;;  %s652_s8 = sphi %s678_s8, %s934_s8   ;;  %s648_s7 = sphi %s676_s7, %s933_s7   ;;  %s644_s6 = sphi %s674_s6, %s932_s6  }
   0x6   : > { %s699_s12 = sadd.s32 1, %s656_s9   ;;  %s24_s13 = sadd.s32 1, %s652_s8 }
   0x7   : > { %s21_s14 = ssub.s32 %s656_s9, %s699_s12  ;;  %p31_p0 = scmp.ne.s32.totalorder %s652_s8, %s648_s7 }
   0x8   : > { %p22_p1 = scmp.eq.s32.totalorder %s21_s14, 0  ;;  %p32_p2 = scmp.eq.s32.totalorder %s656_s9, 0 }
   0x9   : > { %p37_p3 = scmp.ne.s32.totalorder %s648_s7, %s644_s6  ;;  %p38_p4 = scmp.eq.s32.totalorder %s695_s10, 0 }
   0xa   : > { %s711_s15 = scalar_select %p22_p1, %s652_s8, %s24_s13  }
   0xb   : > { %p713_p5 = por %p32_p2, %p31_p0  ;;  %p717_p6 = por %p38_p4, %p37_p3 }
   0xc   : > { %p61_p7 = scmp.eq.s32.totalorder %s695_s10, 1  ;;  %p67_p8 = scmp.eq.s32.totalorder %s482_s11, 1 }
   0xd   : > { %s924_s17 = scalar_select %p717_p6, 1, 0 }
   0xe   : > { %p514_p10 = scmp.lt.s32.totalorder %s656_s9, 2  ;;  %p724_p11 = por %p61_p7, %p31_p0 }
   0xf   : > { %p728_p12 = por %p67_p8, %p37_p3  ;;  %s87_s20 = sand.u32 1, %s652_s8  }
  0x10   : > { %s925_s18 = scalar_select %p724_p11, 1, 0 }
  0x11   : > { %s926_s19 = scalar_select %p728_p12, 1, 0 }
  0x12   : > { %s499_s21 = sshll.u32 %s656_s9, 10  ;;  %s485_s22 = sshll.u32 %s87_s20, 6 }
  0x13   : > { %s737_s25 = scalar_lea.hbm %s919_s0, %s499_s21  ;;  %s91_s26 = scalar_lea.vmem [#allocation2], %s485_s22 }
  0x14   : > { %s99_s27 = sshll.u32 %s91_s26, 4  ;;  %p741_p13 = pnand %p514_p10, %p713_p5  ;;  %s745_s27 = int_to_ptr.vmem [resolvable:$true] %s99_s27 }
  0x15   : > { %s747_s29 = scalar_lea.sflag [#allocation3], %s87_s20  ;;  %s564_s30 = scalar_lea.hbm %s737_s25, 1024 }
  0x16   : > { %p565_p0 = scmp.ne.s32.totalorder %s737_s25, %s564_s30  ;;  %p566_p1 = pneg %p741_p13 }
  0x17   : > { %s569_s4 = scalar_lea.hbm %s919_s0, 2048  ;;  %p570_p4 = scmp.lt.s32.totalorder %s737_s25, %s919_s0 }
  0x18   : > { %p567_p2 = pnand %p566_p1, %p565_p0  ;;  %p571_p5 = scmp.lt.s32.totalorder %s569_s4, %s564_s30 }
  0x1a   : > { %p568_p3 = pneg %p567_p2  ;;  %p572_p7 = por %p571_p5, %p570_p4 }
  0x1c   : > { %p573_p8 = pnand %p572_p7, %p568_p3 }
  0x1e   : > { %576 = shalt.err (!%p573_p8)
}
  0x1f   : > { %s577_s13 = scalar_lea.vmem %s745_s27, 1024  ;;  %s658_s14 = smov [#allocation2]  }
  0x20   : > { %p578_p10 = scmp.ne.s32.totalorder %s745_s27, %s577_s13  ;;  %s582_s16 = sshll.u32 %s658_s14, 4  ;;  %s583_s16 = int_to_ptr.vmem [resolvable:$false] %s582_s16 }
  0x21   : > { %s584_s20 = scalar_lea.vmem %s583_s16, 2048  ;;  %p585_p2 = scmp.lt.s32.totalorder %s745_s27, %s583_s16 }
  0x22   : > { %p580_p9 = pnand %p578_p10, %p566_p1  ;;  %p586_p12 = scmp.lt.s32.totalorder %s584_s20, %s577_s13 }
  0x24   : > { %p581_p0 = pneg %p580_p9  ;;  %p587_p11 = por %p586_p12, %p585_p2 }
  0x26   : > { %p588_p6 = pnand %p587_p11, %p581_p0 }
  0x28   : > { %591 = shalt.err (!%p588_p6)
}
  0x29   : > { %s659_s21 = smov 128   ;;  %s660_s22 = smov 8  }
  0x2a   : > { %509 = dma.hbm_to_vmem [thread:$0]  (!%p741_p13), %s737_s25, 1024, %s745_s27, %s747_s29, %s659_s21, %s659_s21, %s660_s22  }
  0x2b   : > { %p489_p9 = scmp.ge.s32.totalorder %s656_s9, 1  ;;  %p107_p1 = scmp.lt.s32.totalorder %s656_s9, 3 }
  0x2d   : > { %p108_p3 = pnand %p489_p9, %p107_p1 }
  0x2e   : > { %s771_s23 = sand.u32 (!%p108_p3), 1, %s648_s7   ;;  %p928_p6 = scmp.ne.s32.totalorder (!%p108_p3), %s924_s17, 0 }
  0x2f   : > { %111 = sbr.rel (%p108_p3) target bundleno = 647 (0x287), region = 24  ;;  %s490_s24 = sshll.u32 (!%p108_p3), %s771_s23, 6 }
  0x30   : > { %s114_s26 = scalar_lea.sflag (!%p108_p3), [#allocation3], %s771_s23  ;;  %s117_s30 = scalar_lea.vmem (!%p108_p3), [#allocation2], %s490_s24 }
  0x34   : > { %635 = dma.done.wait (%p928_p6), %s114_s26, 1024  }
  0x35   : > { %637 = vsyncadd (%p928_p6), %s114_s26, 4294966272  ;;  %v142_v0 = vld [vmem:[%s117_s30 + $0x20] sm:$0xff]  ;;  %v143_v2 = vld [vmem:[%s117_s30 + $0x28] sm:$0xff]  ;;  %s135_s17 = scalar_lea.vmem [#allocation5], %s490_s24  ;;  %s501_s25 = sshll.u32 %s695_s10, 10 }
  0x36   : > { %v138_v1 = vld [vmem:[%s117_s30] sm:$0xff]  ;;  %154 = vadd.xlane.f32.xlu1 %v142_v0  ;;  %v139_v3 = vld [vmem:[%s117_s30 + $0x8] sm:$0xff]  ;;  %v144_v4 = vld [vmem:[%s117_s30 + $0x30] sm:$0xff]  ;;  %s409_s27 = sshll.u32 %s135_s17, 4  ;;  %s870_s2 = scalar_lea.hbm %s920_s1, %s501_s25  ;;  %s872_s27 = int_to_ptr.vmem [resolvable:$true] %s409_s27 }
  0x37   : > { %146 = vadd.xlane.f32.xlu0 %v138_v1  ;;  %v140_v5 = vld [vmem:[%s117_s30 + $0x10] sm:$0xff]  ;;  %v145_v6 = vld [vmem:[%s117_s30 + $0x38] sm:$0xff]  ;;  %s395_s10 = scalar_lea.sflag [#allocation4], %s771_s23  ;;  %s592_s3 = scalar_lea.vmem %s872_s27, 1024 }
  0x38   : > { %v141_v7 = vld [vmem:[%s117_s30 + $0x18] sm:$0xff]  ;;  %p593_p11 = scmp.ne.s32.totalorder %s872_s27, %s592_s3  ;;  %p929_p12 = scmp.ne.s32.totalorder %s925_s18, 0 }
  0x39   : > { %s661_s4 = smov [#allocation5]  }
  0x3a   : > { %156 = vadd.xlane.f32.xlu1 %v143_v2  ;;  %p594_p13 = pnand %p593_p11, %p929_p12  ;;  %s596_s5 = sshll.u32 %s661_s4, 4  ;;  %s597_s5 = int_to_ptr.vmem [resolvable:$false] %s596_s5 }
  0x3b   : > { %148 = vadd.xlane.f32.xlu0 %v139_v3  ;;  %s598_s11 = scalar_lea.vmem %s597_s5, 2048  ;;  %p599_p5 = scmp.lt.s32.totalorder %s872_s27, %s597_s5 }
  0x3c   : > { %p595_p4 = pneg %p594_p13  ;;  %p600_p7 = scmp.lt.s32.totalorder %s598_s11, %s592_s3 }
  0x3e   : > { %158 = vadd.xlane.f32.xlu1 %v144_v4  ;;  %p601_p8 = por %p600_p7, %p599_p5 }
  0x3f   : > { %150 = vadd.xlane.f32.xlu0 %v140_v5 }
  0x40   : > { %p602_p10 = pnand %p601_p8, %p595_p4 }
  0x42   : > { %160 = vadd.xlane.f32.xlu1 %v145_v6 }
  0x43   : > { %152 = vadd.xlane.f32.xlu0 %v141_v7 }
  0xbf   : > { %v155_v8 = vpop.xlane.xlu1 %154 }
  0xc0   : > { %v147_v9 = vpop.xlane.xlu0 %146 }
  0xc3   : > { %v157_v10 = vpop.xlane.xlu1 %156 }
  0xc4   : > { %v149_v11 = vpop.xlane.xlu0 %148  ;;  %v171_v14 = vadd.f32 %v157_v10, %v155_v8 }
  0xc5   : > { %v162_v15 = vadd.f32 %v149_v11, %v147_v9 }
  0xc7   : > { %v159_v12 = vpop.xlane.xlu1 %158 }
  0xc8   : > { %v151_v13 = vpop.xlane.xlu0 %150  ;;  %v172_v16 = vadd.f32 %v171_v14, %v159_v12 }
  0xc9   : > { %v163_v17 = vadd.f32 %v162_v15, %v151_v13 }
  0xcb   : > { %v161_v18 = vpop.xlane.xlu1 %160 }
  0xcc   : > { %v153_v19 = vpop.xlane.xlu0 %152  ;;  %v173_v20 = vadd.f32 %v172_v16, %v161_v18 }
  0xcd   : > { %v164_v21 = vadd.f32 %v163_v17, %v153_v19 }
  0xce   : > { %v174_v22 = vrot.slane %v173_v20, 4 }
  0xcf   : > { %v165_v23 = vrot.slane %v164_v21, 4 }
  0xd0   : > { %v175_v24 = vadd.f32 %v174_v22, %v173_v20 }
  0xd1   : > { %v166_v25 = vadd.f32 %v165_v23, %v164_v21 }
  0xd2   : > { %v176_v26 = vrot.slane %v175_v24, 2 }
  0xd3   : > { %v167_v27 = vrot.slane %v166_v25, 2 }
  0xd4   : > { %v177_v28 = vadd.f32 %v176_v26, %v175_v24 }
  0xd5   : > { %v168_v29 = vadd.f32 %v167_v27, %v166_v25 }
  0xd6   : > { %v178_v30 = vrot.slane %v177_v28, 1 }
  0xd7   : > { %v169_v31 = vrot.slane %v168_v29, 1 }
  0xd8   : > { %v179_v32 = vadd.f32 %v178_v30, %v177_v28 }
  0xd9   : > { %v170_v33 = vadd.f32 %v169_v31, %v168_v29 }
  0xda   : > { %v181_v34 = vmul.f32 0.00024414063, %v179_v32 }
  0xdb   : > { %v180_v35 = vmul.f32 0.00024414063, %v170_v33 }
  0xdc   : > { %v789_v40 = vsub.f32 %v143_v2, %v181_v34  ;;  %v791_v41 = vsub.f32 %v142_v0, %v181_v34  ;;  %v797_v44 = vsub.f32 %v144_v4, %v181_v34  ;;  %v805_v48 = vsub.f32 %v145_v6, %v181_v34 }
  0xdd   : > { %v781_v36 = vsub.f32 %v139_v3, %v180_v35  ;;  %v783_v37 = vsub.f32 %v138_v1, %v180_v35  ;;  %v799_v45 = vsub.f32 %v140_v5, %v180_v35  ;;  %v185_v49 = vsub.f32 %v141_v7, %v180_v35 }
  0xde   : > { %v195_v42 = vmul.f32 %v789_v40, %v789_v40  ;;  %v194_v43 = vmul.f32 %v791_v41, %v791_v41  ;;  %v196_v46 = vmul.f32 %v797_v44, %v797_v44  ;;  %v197_v50 = vmul.f32 %v805_v48, %v805_v48 }
  0xdf   : > { %v191_v38 = vmul.f32 %v781_v36, %v781_v36  ;;  %v190_v39 = vmul.f32 %v783_v37, %v783_v37  ;;  %v192_v47 = vmul.f32 %v799_v45, %v799_v45  ;;  %v193_v51 = vmul.f32 %v185_v49, %v185_v49 }
  0xe1   : > { %200 = vadd.xlane.f32.xlu1 %v191_v38  ;;  %198 = vadd.xlane.f32.xlu0 %v190_v39 }
  0xe5   : > { %208 = vadd.xlane.f32.xlu1 %v195_v42  ;;  %206 = vadd.xlane.f32.xlu0 %v194_v43 }
  0xe9   : > { %210 = vadd.xlane.f32.xlu1 %v196_v46  ;;  %202 = vadd.xlane.f32.xlu0 %v192_v47 }
  0xed   : > { %212 = vadd.xlane.f32.xlu1 %v197_v50  ;;  %204 = vadd.xlane.f32.xlu0 %v193_v51 }
 0x16a   : > { %v201_v52 = vpop.xlane.xlu1 %200  ;;  %v199_v53 = vpop.xlane.xlu0 %198 }
 0x16b   : > { %v214_v58 = vadd.f32 %v201_v52, %v199_v53 }
 0x16e   : > { %v209_v54 = vpop.xlane.xlu1 %208  ;;  %v207_v55 = vpop.xlane.xlu0 %206 }
 0x16f   : > { %v223_v59 = vadd.f32 %v209_v54, %v207_v55 }
 0x172   : > { %v211_v56 = vpop.xlane.xlu1 %210  ;;  %v203_v57 = vpop.xlane.xlu0 %202 }
 0x173   : > { %v224_v60 = vadd.f32 %v223_v59, %v211_v56  ;;  %v215_v61 = vadd.f32 %v214_v58, %v203_v57 }
 0x176   : > { %v213_v62 = vpop.xlane.xlu1 %212  ;;  %v205_v63 = vpop.xlane.xlu0 %204 }
 0x177   : > { %v225_v0 = vadd.f32 %v224_v60, %v213_v62  ;;  %v216_v1 = vadd.f32 %v215_v61, %v205_v63 }
 0x179   : > { %v226_v2 = vrot.slane %v225_v0, 4  ;;  %v217_v3 = vrot.slane %v216_v1, 4 }
 0x17b   : > { %v227_v4 = vadd.f32 %v226_v2, %v225_v0  ;;  %v218_v5 = vadd.f32 %v217_v3, %v216_v1 }
 0x17d   : > { %v228_v6 = vrot.slane %v227_v4, 2  ;;  %v219_v7 = vrot.slane %v218_v5, 2 }
 0x17f   : > { %v229_v8 = vadd.f32 %v228_v6, %v227_v4  ;;  %v220_v9 = vadd.f32 %v219_v7, %v218_v5 }
 0x181   : > { %v230_v10 = vrot.slane %v229_v8, 1  ;;  %v221_v11 = vrot.slane %v220_v9, 1 }
 0x183   : > { %v231_v12 = vadd.f32 %v230_v10, %v229_v8  ;;  %v222_v13 = vadd.f32 %v221_v11, %v220_v9 }
 0x185   : > { %v233_v14 = vmul.f32 0.00024420026, %v231_v12  ;;  %v232_v15 = vmul.f32 0.00024420026, %v222_v13 }
 0x187   : > { %552 = vrsqrt.f32 %v233_v14  ;;  %vm243_vm0 = vcmp.eq.f32.partialorder %v233_v14, inf  ;;  %vm236_vm1 = vcmp.eq.f32.partialorder %v232_v15, inf  ;;  %v239_v20 = vand.u32 2147483648, %v232_v15 }
 0x188   : > { %554 = vrsqrt.f32 %v232_v15  ;;  %vm238_vm2 = vcmp.eq.f32.partialorder %v232_v15, 0.0  ;;  %v246_v23 = vand.u32 2147483648, %v233_v14  ;;  %vm245_vm3 = vcmp.eq.f32.partialorder %v233_v14, 0.0 }
 0x194   : > { %v553_v16 = vpop.eup %552 }
 0x195   : > { %v555_v17 = vpop.eup %554  ;;  %v242_v18 = vmul.f32 %v553_v16, %v233_v14 }
 0x196   : > { %v235_v19 = vmul.f32 %v555_v17, %v232_v15 }
 0x197   : > { %v244_v21 = vsel %vm243_vm0, %v233_v14, %v242_v18 }
 0x198   : > { %v237_v22 = vsel %vm236_vm1, %v232_v15, %v235_v19  ;;  %v247_v26 = vsel %vm245_vm3, %v246_v23, %v244_v21 }
 0x199   : > { %v240_v24 = vsel %vm238_vm2, %v239_v20, %v237_v22  ;;  %v249_v27 = vadd.f32 1e-06, %v247_v26 }
 0x19a   : > { %v248_v25 = vadd.f32 1e-06, %v240_v24 }
 0x19c   : > { %556 = vrcp.f32 %v248_v25 }
 0x19d   : > { %558 = vrcp.f32 %v249_v27 }
 0x1a9   : > { %v557_v28 = vpop.eup %556 }
 0x1aa   : > { %v810_v29 = vmul.f32 %v557_v28, %v781_v36  ;;  %v813_v30 = vmul.f32 %v557_v28, %v783_v37  ;;  %v817_v31 = vmul.f32 %v557_v28, %v185_v49  ;;  %v820_v32 = vmul.f32 %v557_v28, %v799_v45  ;;  %v559_v33 = vpop.eup %558 }
 0x1ab   : > { %v825_v34 = vmul.f32 %v559_v33, %v789_v40  ;;  %v828_v35 = vmul.f32 %v559_v33, %v791_v41  ;;  %v833_v36 = vmul.f32 %v559_v33, %v805_v48  ;;  %v836_v37 = vmul.f32 %v559_v33, %v797_v44 }
 0x1ac   : > { %264 = vmin.xlane.f32.xlu1 %v810_v29  ;;  %262 = vmin.xlane.f32.xlu0 %v813_v30 }
 0x1b0   : > { %268 = vmin.xlane.f32.xlu1 %v817_v31  ;;  %266 = vmin.xlane.f32.xlu0 %v820_v32 }
 0x1b4   : > { %272 = vmin.xlane.f32.xlu1 %v825_v34  ;;  %270 = vmin.xlane.f32.xlu0 %v828_v35 }
 0x1b8   : > { %276 = vmin.xlane.f32.xlu1 %v833_v36  ;;  %274 = vmin.xlane.f32.xlu0 %v836_v37 }
 0x1bc   : > { %298 = vmax.xlane.f32.xlu1 %v810_v29  ;;  %296 = vmax.xlane.f32.xlu0 %v813_v30 }
 0x1c0   : > { %302 = vmax.xlane.f32.xlu1 %v817_v31  ;;  %300 = vmax.xlane.f32.xlu0 %v820_v32 }
 0x1c4   : > { %306 = vmax.xlane.f32.xlu1 %v825_v34  ;;  %304 = vmax.xlane.f32.xlu0 %v828_v35 }
 0x1c8   : > { %310 = vmax.xlane.f32.xlu1 %v833_v36  ;;  %308 = vmax.xlane.f32.xlu0 %v836_v37 }
 0x235   : > { %v265_v38 = vpop.xlane.xlu1 %264  ;;  %v263_v39 = vpop.xlane.xlu0 %262 }
 0x239   : > { %v269_v40 = vpop.xlane.xlu1 %268  ;;  %v267_v41 = vpop.xlane.xlu0 %266 }
 0x23a   : > { %v279_v42 = vmin.f32 %v265_v38, %v269_v40  ;;  %v278_v43 = vmin.f32 %v263_v39, %v267_v41 }
 0x23c   : > { %v280_v46 = vmin.f32 %v278_v43, %v279_v42 }
 0x23d   : > { %v273_v44 = vpop.xlane.xlu1 %272  ;;  %v271_v45 = vpop.xlane.xlu0 %270 }
 0x23e   : > { %v281_v49 = vrot.slane %v280_v46, 4 }
 0x240   : > { %v282_v54 = vmin.f32 %v280_v46, %v281_v49 }
 0x241   : > { %v277_v47 = vpop.xlane.xlu1 %276  ;;  %v275_v48 = vpop.xlane.xlu0 %274 }
 0x242   : > { %v288_v52 = vmin.f32 %v273_v44, %v277_v47  ;;  %v287_v53 = vmin.f32 %v271_v45, %v275_v48  ;;  %v283_v60 = vrot.slane %v282_v54, 2 }
 0x244   : > { %v289_v57 = vmin.f32 %v287_v53, %v288_v52  ;;  %v284_v2 = vmin.f32 %v282_v54, %v283_v60 }
 0x245   : > { %v299_v50 = vpop.xlane.xlu1 %298  ;;  %v297_v51 = vpop.xlane.xlu0 %296 }
 0x246   : > { %v290_v0 = vrot.slane %v289_v57, 4  ;;  %v285_v10 = vrot.slane %v284_v2, 1 }
 0x248   : > { %v291_v6 = vmin.f32 %v289_v57, %v290_v0  ;;  %v286_v16 = vmin.f32 %v284_v2, %v285_v10 }
 0x249   : > { %v303_v55 = vpop.xlane.xlu1 %302  ;;  %v301_v56 = vpop.xlane.xlu0 %300 }
 0x24a   : > { %v313_v58 = vmax.f32 %v299_v50, %v303_v55  ;;  %v312_v59 = vmax.f32 %v297_v51, %v301_v56  ;;  %v292_v13 = vrot.slane %v291_v6, 2  ;;  %v342_v33 = vmax.f32 %v813_v30, %v286_v16 }
 0x24b   : > { %v343_v38 = vmax.f32 %v810_v29, %v286_v16  ;;  %v344_v39 = vmax.f32 %v820_v32, %v286_v16  ;;  %v345_v40 = vmax.f32 %v817_v31, %v286_v16 }
 0x24c   : > { %v314_v61 = vmax.f32 %v312_v59, %v313_v58  ;;  %v293_v19 = vmin.f32 %v291_v6, %v292_v13 }
 0x24d   : > { %v307_v62 = vpop.xlane.xlu1 %306  ;;  %v305_v63 = vpop.xlane.xlu0 %304 }
 0x24e   : > { %v315_v1 = vrot.slane %v314_v61, 4  ;;  %v294_v22 = vrot.slane %v293_v19, 1 }
 0x250   : > { %v316_v3 = vmax.f32 %v314_v61, %v315_v1  ;;  %v295_v26 = vmin.f32 %v293_v19, %v294_v22 }
 0x251   : > { %v311_v4 = vpop.xlane.xlu1 %310  ;;  %v309_v5 = vpop.xlane.xlu0 %308 }
 0x252   : > { %v322_v7 = vmax.f32 %v307_v62, %v311_v4  ;;  %v317_v8 = vrot.slane %v316_v3, 2  ;;  %v321_v9 = vmax.f32 %v305_v63, %v309_v5  ;;  %v346_v52 = vmax.f32 %v828_v35, %v295_v26 }
 0x253   : > { %v347_v53 = vmax.f32 %v825_v34, %v295_v26  ;;  %v348_v54 = vmax.f32 %v836_v37, %v295_v26  ;;  %v349_v55 = vmax.f32 %v833_v36, %v295_v26 }
 0x254   : > { %v318_v11 = vmax.f32 %v316_v3, %v317_v8  ;;  %v323_v12 = vmax.f32 %v321_v9, %v322_v7 }
 0x256   : > { %v319_v14 = vrot.slane %v318_v11, 1  ;;  %v324_v15 = vrot.slane %v323_v12, 4 }
 0x258   : > { %v320_v17 = vmax.f32 %v318_v11, %v319_v14  ;;  %v325_v18 = vmax.f32 %v323_v12, %v324_v15 }
 0x25a   : > { %v330_v20 = vsub.f32 %v320_v17, %v286_v16  ;;  %v326_v21 = vrot.slane %v325_v18, 2  ;;  %v350_v41 = vmin.f32 %v342_v33, %v320_v17  ;;  %v351_v43 = vmin.f32 %v343_v38, %v320_v17 }
 0x25b   : > { %v352_v44 = vmin.f32 %v344_v39, %v320_v17  ;;  %v353_v45 = vmin.f32 %v345_v40, %v320_v17 }
 0x25c   : > { %vm332_vm4 = vcmp.gt.f32.partialorder %v330_v20, 1e-06  ;;  %v327_v24 = vmax.f32 %v325_v18, %v326_v21  ;;  %v358_v47 = vsub.f32 %v350_v41, %v286_v16  ;;  %v359_v48 = vsub.f32 %v351_v43, %v286_v16 }
 0x25d   : > { %v334_v23 = vsel %vm332_vm4, %v330_v20, 1.0  ;;  %v360_v49 = vsub.f32 %v352_v44, %v286_v16  ;;  %v361_v30 = vsub.f32 %v353_v45, %v286_v16 }
 0x25e   : > { %560 = vrcp.f32 %v334_v23  ;;  %v328_v25 = vrot.slane %v327_v24, 1 }
 0x260   : > { %v329_v27 = vmax.f32 %v327_v24, %v328_v25 }
 0x262   : > { %v331_v28 = vsub.f32 %v329_v27, %v295_v26  ;;  %v354_v34 = vmin.f32 %v346_v52, %v329_v27  ;;  %v355_v35 = vmin.f32 %v347_v53, %v329_v27  ;;  %v356_v60 = vmin.f32 %v348_v54, %v329_v27 }
 0x263   : > { %v357_v37 = vmin.f32 %v349_v55, %v329_v27 }
 0x264   : > { %vm333_vm5 = vcmp.gt.f32.partialorder %v331_v28, 1e-06  ;;  %v362_v61 = vsub.f32 %v354_v34, %v295_v26  ;;  %v363_v62 = vsub.f32 %v355_v35, %v295_v26  ;;  %v364_v63 = vsub.f32 %v356_v60, %v295_v26 }
 0x265   : > { %v335_v42 = vsel %vm333_vm5, %v331_v28, 1.0  ;;  %v365_v0 = vsub.f32 %v357_v37, %v295_v26 }
 0x266   : > { %562 = vrcp.f32 %v335_v42 }
 0x26b   : > { %v561_v46 = vpop.eup %560 }
 0x26c   : > { %v340_v29 = vsel %vm332_vm4, %v561_v46, 0.0 }
 0x26d   : > { %v366_v50 = vmul.f32 %v358_v47, %v340_v29  ;;  %v367_v32 = vmul.f32 %v359_v48, %v340_v29  ;;  %v368_v51 = vmul.f32 %v360_v49, %v340_v29  ;;  %v369_v31 = vmul.f32 %v361_v30, %v340_v29 }
 0x26f   : > { %v378_v56 = vsel %vm332_vm4, %v366_v50, 0.0  ;;  %v379_v57 = vsel %vm332_vm4, %v367_v32, 0.0  ;;  %v380_v58 = vsel %vm332_vm4, %v368_v51, 0.0  ;;  %v381_v59 = vsel %vm332_vm4, %v369_v31, 0.0 }
 0x270   : > { %386 = vst [vmem:[%s135_s17] sm:$0xff] %v378_v56  ;;  %387 = vst [vmem:[%s135_s17 + $0x8] sm:$0xff] %v379_v57 }
 0x271   : > { %388 = vst [vmem:[%s135_s17 + $0x10] sm:$0xff] %v380_v58  ;;  %389 = vst [vmem:[%s135_s17 + $0x18] sm:$0xff] %v381_v59 }
 0x273   : > { %v563_v36 = vpop.eup %562 }
 0x274   : > { %v341_v1 = vsel %vm333_vm5, %v563_v36, 0.0 }
 0x275   : > { %v370_v2 = vmul.f32 %v362_v61, %v341_v1  ;;  %v371_v3 = vmul.f32 %v363_v62, %v341_v1  ;;  %v372_v4 = vmul.f32 %v364_v63, %v341_v1  ;;  %v373_v5 = vmul.f32 %v365_v0, %v341_v1 }
 0x277   : > { %v382_v6 = vsel %vm333_vm5, %v370_v2, 0.0  ;;  %v383_v7 = vsel %vm333_vm5, %v371_v3, 0.0  ;;  %v384_v8 = vsel %vm333_vm5, %v372_v4, 0.0  ;;  %v385_v9 = vsel %vm333_vm5, %v373_v5, 0.0 }
 0x278   : > { %390 = vst [vmem:[%s135_s17 + $0x20] sm:$0xff] %v382_v6  ;;  %391 = vst [vmem:[%s135_s17 + $0x28] sm:$0xff] %v383_v7 }
 0x279   : > { %392 = vst [vmem:[%s135_s17 + $0x30] sm:$0xff] %v384_v8  ;;  %393 = vst [vmem:[%s135_s17 + $0x38] sm:$0xff] %v385_v9 }
 0x27a   : > { %605 = shalt.err (!%p602_p10)
}
 0x27b   : > { %s606_s13 = scalar_lea.hbm %s870_s2, 1024  ;;  %s610_s20 = scalar_lea.hbm %s920_s1, 2048 }
 0x27c   : > { %p607_p0 = scmp.ne.s32.totalorder %s870_s2, %s606_s13  ;;  %p611_p1 = scmp.lt.s32.totalorder %s870_s2, %s920_s1 }
 0x27d   : > { %p612_p3 = scmp.lt.s32.totalorder %s610_s20, %s606_s13 }
 0x27e   : > { %p608_p2 = pnand %p607_p0, %p929_p12 }
 0x27f   : > { %p613_p6 = por %p612_p3, %p611_p1 }
 0x280   : > { %p609_p9 = pneg %p608_p2 }
 0x282   : > { %p614_p11 = pnand %p613_p6, %p609_p9 }
 0x284   : > { %617 = shalt.err (!%p614_p11)
}
 0x285   : > { %s662_s24 = smov 128   ;;  %s663_s26 = smov 8  }
 0x286   : > { %504 = dma.vmem_to_hbm [thread:$0]  (%p929_p12), %s872_s27, 1024, %s870_s2, %s395_s10, %s662_s24, %s662_s24, %s663_s26  }
 0x287 PF: > { %s424_s30 = sand.u32 1, %s644_s6   ;;  %p930_p13 = scmp.ne.s32.totalorder %s926_s19, 0 }
 0x288   : > { %p931_p4 = scmp.ge.s32.totalorder %s656_s9, 2  ;;  %s425_s17 = scalar_lea.sflag [#allocation4], %s424_s30 }
 0x28a   : > { %p511_p5 = pnand %p931_p4, %p930_p13 }
 0x28c   : > { %p512_p7 = pneg %p511_p5 }
 0x28e   : > { %639 = dma.done.wait (%p512_p7), %s425_s17, 1024  }
 0x28f   : > { %641 = vsyncadd (%p512_p7), %s425_s17, 4294966272  ;;  %p14_p8 = scmp.ge.s32.totalorder %s699_s12, 4   ;;  %s932_s6 = smov %s648_s7 }
 0x290   : > { %s933_s7 = smov %s652_s8  ;;  %s934_s8 = smov %s711_s15 }
 0x291   : > { %s935_s9 = smov %s699_s12  ;;  %16 = sbr.rel (!%p14_p8) target bundleno = 5 (0x5), region = 69 }
 0x296   :  { %430 = vsyncpa [#allocation3], 1 }
 0x297   :  { %432 = vsyncpa [#allocation3 + $0x1], 1 }
 0x298   :  { %433 = vsyncpa [#allocation4], 1 }
 0x299   :  { %435 = vsyncpa [#allocation4 + $0x1], 1 }

</bundles_post_ra>
